<compile_context>
chip_gen: v6e
topology: v6e:2x2x1
jax: 0.10.0
libtpu: 0.0.40
codegen_flags: <defaults>
</compile_context>

<pallas_src>
import math

import jax
import jax.numpy as jnp
from jax.experimental import pallas as pl
from jax.experimental.pallas import tpu as pltpu


def _modulate_kernel(scale_ref, bias_ref, x_ref, o_ref):
    """One grid step handles one (TR, TC) tile of the flattened activations.

    scale_ref : (TR, 1)  -- per-row modulation scale (f32)
    bias_ref  : (TR, 1)  -- per-row modulation bias  (f32)
    x_ref     : (TR, TC) -- activation tile
    o_ref     : (TR, TC) -- output tile
    """
    x = x_ref[...].astype(jnp.float32)
    o_ref[...] = (x * scale_ref[...] + bias_ref[...]).astype(o_ref.dtype)


# Total VMEM devoted to the double-buffered blocks (x + out + scale + bias).
# Kept <= ~36-40 MiB so it fits v7x's 64 MiB physical VMEM with headroom; on
# v5e/v6e (128 MiB) this is comfortably below the measured ~8 MiB-tile plateau.
_VMEM_BLOCK_BUDGET = 36 << 20


def _row_bytes(tc, itemsize):
    # One buffer set, per row: x row + out row + lane-padded scale & bias rows.
    return 2 * tc * itemsize + 2 * 128 * 4


def _choose_tiles(rows, cols, itemsize):
    """Pick (TR, TC). Prefer full-width (contiguous-DMA) column tiles."""
    if 2 * 8 * _row_bytes(cols, itemsize) <= _VMEM_BLOCK_BUDGET:
        tc = cols  # full extent: always a legal last block dim, one contiguous DMA
    else:
        # Enormous spatial maps only: tile columns at a large multiple of 128.
        tc = max(128, (_VMEM_BLOCK_BUDGET // (2 * 8 * 2 * itemsize)) // 128 * 128)

    max_tr = max(8, (_VMEM_BLOCK_BUDGET // (2 * _row_bytes(tc, itemsize))) // 8 * 8)
    tr = min(rows, max_tr)

    if tr == rows and rows >= 16 and rows * cols * itemsize >= (4 << 20):
        # Split the row axis into >=2 tiles so v7x megacore can use both TCs.
        half = (((rows + 1) // 2) + 7) // 8 * 8
        if half < rows:
            tr = half
    return tr, tc


def generator_modulation(x, style, w_scale, b_scale, w_bias, b_bias):
    """x: (B, C, H, W), style: (B, S).

    w_scale / w_bias: (C, S) raw EqualLinear weights (scaled by 1/sqrt(S)).
    b_scale / b_bias: (C,) EqualLinear biases.
    """
    B, C, H, W = x.shape
    S = style.shape[1]
    HW = H * W
    rows = B * C

    # --- EqualLinear modulation params, computed once in the wrapper (XLA). ---
    eq = 1.0 / math.sqrt(S)
    style_f32 = style.astype(jnp.float32)
    ws = w_scale.T.astype(jnp.float32) * eq                     # (S, C)
    wb = w_bias.T.astype(jnp.float32) * eq                      # (S, C)
    mod_scale = style_f32 @ ws + b_scale.astype(jnp.float32)    # (B, C)
    mod_bias = style_f32 @ wb + b_bias.astype(jnp.float32)      # (B, C)

    scale_col = mod_scale.reshape(rows, 1)                      # (B*C, 1)
    bias_col = mod_bias.reshape(rows, 1)                        # (B*C, 1)

    # --- Flatten activations; NO padding / slicing (single HBM pass). ---
    x_flat = x.reshape(rows, HW)
    itemsize = jnp.dtype(x.dtype).itemsize

    TR, TC = _choose_tiles(rows, HW, itemsize)
    grid = (pl.cdiv(rows, TR), pl.cdiv(HW, TC))

    # Explicit VMEM budget: double-buffered (x + out) tiles plus the lane-padded
    # (TR, 1)->(TR, 128) f32 scale/bias blocks, with headroom.
    sb_rows = TR if TR % 8 == 0 else ((TR + 7) // 8) * 8
    tile_bytes = TR * TC * itemsize
    sb_bytes = 2 * 2 * sb_rows * 128 * 4            # 2 arrays x 2 buffers, lane-padded
    vmem_needed = 2 * 2 * tile_bytes + sb_bytes      # 2 buffers x (x tile + out tile)
    vmem_limit = int(max(vmem_needed + (4 << 20), 16 << 20))

    cost = pl.CostEstimate(
        flops=2 * rows * HW,
        transcendentals=0,
        bytes_accessed=2 * rows * HW * itemsize + 2 * rows * 4,
    )

    out_flat = pl.pallas_call(
        _modulate_kernel,
        out_shape=jax.ShapeDtypeStruct((rows, HW), x.dtype),
        grid_spec=pltpu.PrefetchScalarGridSpec(
            num_scalar_prefetch=0,
            grid=grid,
            in_specs=[
                pl.BlockSpec((TR, 1), lambda i, j: (i, 0)),    # scale (per row)
                pl.BlockSpec((TR, 1), lambda i, j: (i, 0)),    # bias  (per row)
                pl.BlockSpec((TR, TC), lambda i, j: (i, j)),   # x tile
            ],
            out_specs=pl.BlockSpec((TR, TC), lambda i, j: (i, j)),
        ),
        compiler_params=pltpu.CompilerParams(
            dimension_semantics=("parallel", "parallel"),
            vmem_limit_bytes=vmem_limit,
        ),
        cost_estimate=cost,
    )(scale_col, bias_col, x_flat)

    return out_flat.reshape(B, C, H, W)


def _reference(x, style, w_scale, b_scale, w_bias, b_bias):
    S = style.shape[1]
    eq = 1.0 / math.sqrt(S)
    ms = style @ (w_scale.T * eq) + b_scale           # (B, C)
    mb = style @ (w_bias.T * eq) + b_bias             # (B, C)
    return x * ms[:, :, None, None] + mb[:, :, None, None]


if __name__ == "__main__":
    # Small shapes consistent with the module: B=2, styledim=32, outch=4, 16x16 spatial.
    B, S, C, H, W = 2, 32, 4, 16, 16

    key = jax.random.PRNGKey(0)
    kx, ks, kw1, kw2, kb1, kb2 = jax.random.split(key, 6)

    x = jax.random.normal(kx, (B, C, H, W), dtype=jnp.float32)
    style = jax.random.normal(ks, (B, S), dtype=jnp.float32)

    # EqualLinear params: weight ~ N(0,1) of shape (outch, styledim); small random
    # biases so the add path is exercised deterministically.
    w_scale = jax.random.normal(kw1, (C, S), dtype=jnp.float32)
    w_bias = jax.random.normal(kw2, (C, S), dtype=jnp.float32)
    b_scale = 0.01 * jax.random.normal(kb1, (C,), dtype=jnp.float32)
    b_bias = 0.01 * jax.random.normal(kb2, (C,), dtype=jnp.float32)

    out = generator_modulation(x, style, w_scale, b_scale, w_bias, b_bias)
    out = jax.block_until_ready(out)

    ref = _reference(x, style, w_scale, b_scale, w_bias, b_bias)
    assert out.shape == (B, C, H, W)
    assert jnp.allclose(out, ref, atol=1e-5, rtol=1e-5), "mismatch vs reference"

    print("KERNEL_OK")
</pallas_src>

<mosaic_0001>
module attributes {stable_mosaic.version = 11 : i64} {
  func.func @_modulate_kernel(%arg0: i32, %arg1: i32, %arg2: memref<8x1xf32, #tpu.memory_space<vmem>>, %arg3: memref<8x1xf32, #tpu.memory_space<vmem>>, %arg4: memref<8x256xf32, #tpu.memory_space<vmem>>, %arg5: memref<8x256xf32, #tpu.memory_space<vmem>>) attributes {dimension_semantics = [#tpu.dimension_semantics<parallel>, #tpu.dimension_semantics<parallel>], iteration_bounds = array<i64: 1, 1>, scalar_prefetch = 0 : i64, scratch_operands = 0 : i64, tpu.core_type = #tpu.core_type<tc>, window_params = [{transform_indices = @transform_0, window_bounds = array<i64: 8, 1>}, {transform_indices = @transform_1, window_bounds = array<i64: 8, 1>}, {transform_indices = @transform_2, window_bounds = array<i64: 8, 256>}, {transform_indices = @transform_3, window_bounds = array<i64: 8, 256>}]} {
    %c0 = arith.constant 0 : index
    %c0_0 = arith.constant 0 : index
    %0 = vector.load %arg4[%c0, %c0_0] : memref<8x256xf32, #tpu.memory_space<vmem>>, vector<8x256xf32>
    %c0_1 = arith.constant 0 : index
    %c0_2 = arith.constant 0 : index
    %1 = vector.load %arg2[%c0_1, %c0_2] : memref<8x1xf32, #tpu.memory_space<vmem>>, vector<8x1xf32>
    %2 = vector.broadcast %1 : vector<8x1xf32> to vector<8x256xf32>
    %3 = arith.mulf %0, %2 : vector<8x256xf32>
    %c0_3 = arith.constant 0 : index
    %c0_4 = arith.constant 0 : index
    %4 = vector.load %arg3[%c0_3, %c0_4] : memref<8x1xf32, #tpu.memory_space<vmem>>, vector<8x1xf32>
    %5 = vector.broadcast %4 : vector<8x1xf32> to vector<8x256xf32>
    %6 = arith.addf %3, %5 : vector<8x256xf32>
    %c0_5 = arith.constant 0 : index
    %c0_6 = arith.constant 0 : index
    %7 = vector.load %arg5[%c0_5, %c0_6] : memref<8x256xf32, #tpu.memory_space<vmem>>, vector<8x256xf32>
    tpu.vector_store %arg5[%c0_5, %c0_6], %6 {strides = array<i32>} : memref<8x256xf32, #tpu.memory_space<vmem>>, vector<8x256xf32>,
    return
  }
  func.func @transform_0(%arg0: i32, %arg1: i32) -> (i32, i32) {
    %c0_i32 = arith.constant 0 : i32
    %c0_i32_0 = arith.constant 0 : i32
    return %arg0, %c0_i32 : i32, i32
  }
  func.func @transform_1(%arg0: i32, %arg1: i32) -> (i32, i32) {
    %c0_i32 = arith.constant 0 : i32
    %c0_i32_0 = arith.constant 0 : i32
    return %arg0, %c0_i32 : i32, i32
  }
  func.func @transform_2(%arg0: i32, %arg1: i32) -> (i32, i32) {
    %c0_i32 = arith.constant 0 : i32
    return %arg0, %arg1 : i32, i32
  }
  func.func @transform_3(%arg0: i32, %arg1: i32) -> (i32, i32) {
    %c0_i32 = arith.constant 0 : i32
    return %arg0, %arg1 : i32, i32
  }
}

</mosaic_0001>

<bundles_post_ra>
// kernel: tpu_custom_call.1
= control target key start
LH: loop header
LB: loop body
LE: loop exit
PB: predicated region body
PF: predicated region fallthrough
CT: control target
= control target key end

     0   :  { %v74_v1 = vmov 0   ;;  %s111_s0 = inlined_call_operand.vmem [shape: f32[8,1], index: 0, kind: input, shape index: {}]   ;;  %s112_s1 = inlined_call_operand.vmem [shape: f32[8,1], index: 1, kind: input, shape index: {}]   ;;  %s113_s2 = inlined_call_operand.vmem [shape: f32[8,256], index: 2, kind: input, shape index: {}]   ;;  %s114_s3 = inlined_call_operand.hbm [shape: f32[8,256], index: 3, kind: output, shape index: {}]  }
   0x1   :  { %v17_v0 = vld [vmem:[%s111_s0] sm:$0xff]  ;;  %51 = vset.pattern.permute.xlu0 %v74_v1 }
   0x2   :  { %8 = vsyncpa [#allocation3], 0  ;;  %20 = vperm.xlu0 %51, %v17_v0   ;;  %v25_v2 = vld [vmem:[%s112_s1] sm:$0xff]  ;;  %v16_v5 = vld [vmem:[%s113_s2 + $0x8] sm:$0xff]  ;;  %s75_s20 = smov [#allocation2]  }
   0x3   :  { %v15_v4 = vld [vmem:[%s113_s2] sm:$0xff]  ;;  %s41_s0 = sshll.u32 %s75_s20, 4  ;;  %s42_s0 = int_to_ptr.vmem [resolvable:$true] %s41_s0 }
   0x4   :  { %s52_s1 = scalar_lea.vmem %s42_s0, 256  ;;  %p57_p1 = scmp.lt.s32.totalorder %s42_s0, %s42_s0 }
   0x5   :  { %p53_p0 = scmp.ne.s32.totalorder %s42_s0, %s52_s1  ;;  %p58_p2 = scmp.lt.s32.totalorder %s52_s1, %s52_s1 }
   0x6   :  { %28 = vperm.xlu0 %51, %v25_v2  }
   0x7   :  { %p59_p3 = por %p58_p2, %p57_p1 }
   0x9   :  { %p60_p4 = pnand %p59_p3, %p53_p0 }
  0x7d   :  { %v21_v3 = vpop.permute.xlu0 %20 }
  0x7e   :  { %v23_v6 = vmul.f32 %v21_v3, %v15_v4  ;;  %v24_v7 = vmul.f32 %v21_v3, %v16_v5 }
  0x81   :  { %v29_v8 = vpop.permute.xlu0 %28 }
  0x82   :  { %v31_v9 = vadd.f32 %v29_v8, %v23_v6  ;;  %v32_v10 = vadd.f32 %v29_v8, %v24_v7 }
  0x84   :  { %33 = vst [vmem:[#allocation2] sm:$0xff] %v31_v9  ;;  %34 = vst [vmem:[#allocation2 + $0x8] sm:$0xff] %v32_v10 }
  0x85   :  { %63 = shalt.err (!%p60_p4)
}
  0x86   :  { %44 = dma.vmem_to_hbm [thread:$0]  %s42_s0, 256, %s114_s3, [#allocation3]  }
  0x87   :  { %72 = dma.done.wait [#allocation3], 256  }
  0x88   :  { %73 = vsyncadd [#allocation3], 4294967040 }
  0x89   :  { %48 = vsyncpa [#allocation3], 1 }

</bundles_post_ra>
